<compile_context>
chip_gen: v5e
topology: v5e:2x2
jax: 0.10.0
libtpu: 0.0.40
codegen_flags: <defaults>
</compile_context>

<pallas_src>
import jax
import jax.numpy as jnp
from jax.experimental import pallas as pl
from jax.experimental.pallas import tpu as pltpu


# --------------------------------------------------------------------------
# Helpers
# --------------------------------------------------------------------------
def _round_up(v, m):
    return (v + m - 1) // m * m


def _pick_tile(extent, unit, max_tile):
    """Largest multiple of `unit` that divides `extent` and is <= max_tile."""
    max_tile = max(unit, min(max_tile, extent))
    best = unit
    t = unit
    while t <= max_tile:
        if extent % t == 0:
            best = t
        t += unit
    return best


# --------------------------------------------------------------------------
# Kernel: K-tiled  (tm, tk) @ (tk, tn)  with f32 accumulator, then bias + tanh.
# Grid layout: (parallel, parallel, K-reduction) -- K is always grid axis 2.
# --------------------------------------------------------------------------
def _mlp_kernel(x_ref, w_ref, b_ref, o_ref, acc_ref):
    k = pl.program_id(2)

    @pl.when(k == 0)
    def _():
        acc_ref[...] = jnp.zeros_like(acc_ref)

    acc_ref[...] += jnp.dot(x_ref[...], w_ref[...],
                            preferred_element_type=jnp.float32)   # MXU, f32 acc

    @pl.when(k == pl.num_programs(2) - 1)
    def _():
        o_ref[...] = jnp.tanh(acc_ref[...] + b_ref[...]).astype(o_ref.dtype)


# --------------------------------------------------------------------------
# Module wrapper: static preprocessing hoisted to construction time.
# --------------------------------------------------------------------------
class CreateMLP:
    """Pallas TPU forward for `create_mlp` (Linear + Tanh).

    weight: (out, in)  PyTorch nn.Linear layout
    bias:   (out,)
    compute_dtype: e.g. jnp.bfloat16 to run the matmul bf16-native on the MXU
                   (f32 accumulation is kept either way). None = keep x dtype.
    out_dtype: output dtype (None = x dtype).
    """

    def __init__(self, weight, bias, *, block_m=512, block_n=512, block_k=512,
                 compute_dtype=None, out_dtype=None):
        weight = jnp.asarray(weight)
        bias = jnp.asarray(bias)
        N, K = weight.shape

        self.in_chnl = K
        self.out = N
        self.block_m = block_m
        self.compute_dtype = compute_dtype
        self.out_dtype = out_dtype

        # ---- x-independent preprocessing, done ONCE (perf feedback #1) ----
        Np = _round_up(N, 128)
        if K <= block_k:
            Kp, tk, gk = K, K, 1                       # single full-extent K block
        else:
            Kp = _round_up(K, 128)
            tk = _pick_tile(Kp, 128, block_k)          # divides Kp exactly
            gk = Kp // tk

        w = weight.T                                   # (K, N): N on lanes
        if (Kp, Np) != (K, N):
            w = jnp.pad(w, ((0, Kp - K), (0, Np - N)))
        if compute_dtype is not None:
            w = w.astype(compute_dtype)
        b = bias.astype(jnp.float32).reshape(1, N)
        if Np != N:
            b = jnp.pad(b, ((0, 0), (0, Np - N)))

        tn = _pick_tile(Np, 128, block_n)              # lane-dense, divides Np

        self._w, self._b = w, b
        self._N, self._Np = N, Np
        self._K, self._Kp = K, Kp
        self._tk, self._gk, self._tn = tk, gk, tn

        self._forward = jax.jit(self._forward_impl)

    def __call__(self, x):
        return self._forward(x, self._w, self._b)

    # ------------------------------------------------------------------
    def _forward_impl(self, x, w, b):
        orig_shape = x.shape
        K = orig_shape[-1]
        assert K == self._K, "last dim of x must equal in_chnl"
        x2 = x.reshape(-1, K)
        M = x2.shape[0]

        if self.compute_dtype is not None:
            x2 = x2.astype(self.compute_dtype)
        out_dtype = self.out_dtype if self.out_dtype is not None else x.dtype

        N, Np, Kp = self._N, self._Np, self._Kp
        tk, gk, tn = self._tk, self._gk, self._tn

        Mp = _round_up(max(M, 1), 8)
        tm = _pick_tile(Mp, 8, self.block_m)           # divides Mp exactly
        gm, gn = Mp // tm, Np // tn

        # v7x megacore: guarantee >= 2 parallel grid steps (zero cost elsewhere).
        if gm * gn < 2:
            if Np >= 256:
                tn = _pick_tile(Np, 128, Np // 2)
                gn = Np // tn
            elif Mp >= 16:
                tm = _pick_tile(Mp, 8, Mp // 2)
                gm = Mp // tm

        if (Mp, Kp) != (M, K):
            x2 = jnp.pad(x2, ((0, Mp - M), (0, Kp - K)))

        # Keep the larger of {W, x} resident across the inner parallel axis;
        # re-stream the smaller operand (perf feedback: grid-axis order).
        n_outer = (Kp * Np) >= (Mp * Kp)
        if n_outer:
            grid = (gn, gm, gk)
            x_map = lambda j, i, k: (i, k)
            w_map = lambda j, i, k: (k, j)
            b_map = lambda j, i, k: (0, j)
            o_map = lambda j, i, k: (i, j)
        else:
            grid = (gm, gn, gk)
            x_map = lambda i, j, k: (i, k)
            w_map = lambda i, j, k: (k, j)
            b_map = lambda i, j, k: (0, j)
            o_map = lambda i, j, k: (i, j)

        out = pl.pallas_call(
            _mlp_kernel,
            grid=grid,
            out_shape=jax.ShapeDtypeStruct((Mp, Np), out_dtype),
            in_specs=[
                pl.BlockSpec((tm, tk), x_map),         # x tile
                pl.BlockSpec((tk, tn), w_map),         # weight tile
                pl.BlockSpec((1, tn), b_map),          # bias tile
            ],
            out_specs=pl.BlockSpec((tm, tn), o_map),
            scratch_shapes=[pltpu.VMEM((tm, tn), jnp.float32)],
            compiler_params=pltpu.CompilerParams(
                dimension_semantics=("parallel", "parallel", "arbitrary"),
            ),
        )(x2, w, b)

        if (Mp, Np) != (M, N):                         # skip slice when exact
            out = out[:M, :N]
        return out.reshape(*orig_shape[:-1], N)


# --------------------------------------------------------------------------
# Demo / self-test
# --------------------------------------------------------------------------
if __name__ == "__main__":
    key = jax.random.PRNGKey(0)

    # ---- Test 1: edge-attr MLP regime (in_chnl=4, out=512, 28 rows) ----
    kx, kw, kb, key = jax.random.split(key, 4)
    IN_CHNL, OUT, ROWS = 4, 512, 28
    lim = 1.0 / jnp.sqrt(jnp.float32(IN_CHNL))          # PyTorch Linear init
    x = jax.random.normal(kx, (ROWS, IN_CHNL), dtype=jnp.float32)
    weight = jax.random.uniform(kw, (OUT, IN_CHNL), minval=-lim, maxval=lim,
                                dtype=jnp.float32)
    bias = jax.random.uniform(kb, (OUT,), minval=-lim, maxval=lim,
                              dtype=jnp.float32)

    mlp = CreateMLP(weight, bias)                        # preprocessing hoisted
    out = mlp(x)
    jax.block_until_ready(out)

    ref = jnp.tanh(x @ weight.T + bias)
    assert out.shape == (ROWS, OUT)
    assert jnp.all(jnp.isfinite(out))
    assert jnp.allclose(out, ref, atol=1e-5, rtol=1e-5)

    # ---- Test 2: exercise the K-tiled (accumulator) path ----
    kx2, kw2, kb2, key = jax.random.split(key, 4)
    IN2, OUT2, ROWS2 = 256, 384, 40
    lim2 = 1.0 / jnp.sqrt(jnp.float32(IN2))
    x2 = jax.random.normal(kx2, (ROWS2, IN2), dtype=jnp.float32)
    w2 = jax.random.uniform(kw2, (OUT2, IN2), minval=-lim2, maxval=lim2,
                            dtype=jnp.float32)
    b2 = jax.random.uniform(kb2, (OUT2,), minval=-lim2, maxval=lim2,
                            dtype=jnp.float32)

    mlp2 = CreateMLP(w2, b2, block_k=128)                # forces gk = 2
    out2 = mlp2(x2)
    jax.block_until_ready(out2)

    ref2 = jnp.tanh(
        jnp.dot(x2, w2.T, precision=jax.lax.Precision.HIGHEST) + b2)
    assert out2.shape == (ROWS2, OUT2)
    assert jnp.all(jnp.isfinite(out2))
    assert jnp.allclose(out2, ref2, atol=2e-3, rtol=2e-3)

    print("KERNEL_OK")
</pallas_src>

<mosaic_0001>
module attributes {stable_mosaic.version = 11 : i64} {
  func.func @_mlp_kernel(%arg0: i32, %arg1: i32, %arg2: i32, %arg3: memref<32x4xf32, #tpu.memory_space<vmem>>, %arg4: memref<4x256xf32, #tpu.memory_space<vmem>>, %arg5: memref<1x256xf32, #tpu.memory_space<vmem>>, %arg6: memref<32x256xf32, #tpu.memory_space<vmem>>, %arg7: memref<32x256xf32, #tpu.memory_space<vmem>>) attributes {dimension_semantics = [#tpu.dimension_semantics<parallel>, #tpu.dimension_semantics<parallel>, #tpu.dimension_semantics<arbitrary>], iteration_bounds = array<i64: 2, 1, 1>, scalar_prefetch = 0 : i64, scratch_operands = 1 : i64, tpu.core_type = #tpu.core_type<tc>, window_params = [{transform_indices = @transform_0, window_bounds = array<i64: 32, 4>}, {transform_indices = @transform_1, window_bounds = array<i64: 4, 256>}, {transform_indices = @transform_2, window_bounds = array<i64: 1, 256>}, {transform_indices = @transform_3, window_bounds = array<i64: 32, 256>}]} {
    %c0_i32 = arith.constant 0 : i32
    %0 = arith.cmpi eq, %arg2, %c0_i32 : i32
    %1 = arith.extui %0 : i1 to i32
    %c0_i32_0 = arith.constant 0 : i32
    %2 = arith.cmpi ne, %1, %c0_i32_0 : i32
    scf.if %2 {
      %cst_10 = arith.constant 0.000000e+00 : f32
      %12 = vector.broadcast %cst_10 : f32 to vector<32x256xf32>
      %c0_11 = arith.constant 0 : index
      %c0_12 = arith.constant 0 : index
      %13 = vector.load %arg7[%c0_11, %c0_12] : memref<32x256xf32, #tpu.memory_space<vmem>>, vector<32x256xf32>
      tpu.vector_store %arg7[%c0_11, %c0_12], %12 {strides = array<i32>} : memref<32x256xf32, #tpu.memory_space<vmem>>, vector<32x256xf32>,
    } else {
    }
    %c0 = arith.constant 0 : index
    %c0_1 = arith.constant 0 : index
    %3 = vector.load %arg7[%c0, %c0_1] : memref<32x256xf32, #tpu.memory_space<vmem>>, vector<32x256xf32>
    %c0_2 = arith.constant 0 : index
    %c0_3 = arith.constant 0 : index
    %4 = vector.load %arg3[%c0_2, %c0_3] : memref<32x4xf32, #tpu.memory_space<vmem>>, vector<32x4xf32>
    %c0_4 = arith.constant 0 : index
    %c0_5 = arith.constant 0 : index
    %5 = vector.load %arg4[%c0_4, %c0_5] : memref<4x256xf32, #tpu.memory_space<vmem>>, vector<4x256xf32>
    %cst = arith.constant dense<0.000000e+00> : vector<32x256xf32>
    %6 = tpu.matmul %4, %5, %cst {dimension_numbers = #tpu.dot_dimension_numbers<[1], [0], [0], [1], [0, 0, 1, 1], [], []>} : vector<32x4xf32>, vector<4x256xf32>, vector<32x256xf32> -> vector<32x256xf32>
    %7 = arith.addf %3, %6 : vector<32x256xf32>
    %c0_6 = arith.constant 0 : index
    %c0_7 = arith.constant 0 : index
    %8 = vector.load %arg7[%c0_6, %c0_7] : memref<32x256xf32, #tpu.memory_space<vmem>>, vector<32x256xf32>
    tpu.vector_store %arg7[%c0_6, %c0_7], %7 {strides = array<i32>} : memref<32x256xf32, #tpu.memory_space<vmem>>, vector<32x256xf32>,
    %c0_i32_8 = arith.constant 0 : i32
    %9 = arith.cmpi eq, %arg2, %c0_i32_8 : i32
    %10 = arith.extui %9 : i1 to i32
    %c0_i32_9 = arith.constant 0 : i32
    %11 = arith.cmpi ne, %10, %c0_i32_9 : i32
    scf.if %11 {
      %c0_10 = arith.constant 0 : index
      %c0_11 = arith.constant 0 : index
      %12 = vector.load %arg7[%c0_10, %c0_11] : memref<32x256xf32, #tpu.memory_space<vmem>>, vector<32x256xf32>
      %c0_12 = arith.constant 0 : index
      %c0_13 = arith.constant 0 : index
      %13 = vector.load %arg5[%c0_12, %c0_13] : memref<1x256xf32, #tpu.memory_space<vmem>>, vector<1x256xf32>
      %14 = vector.broadcast %13 : vector<1x256xf32> to vector<32x256xf32>
      %15 = arith.addf %12, %14 : vector<32x256xf32>
      %16 = math.tanh %15 : vector<32x256xf32>
      %c0_14 = arith.constant 0 : index
      %c0_15 = arith.constant 0 : index
      %17 = vector.load %arg6[%c0_14, %c0_15] : memref<32x256xf32, #tpu.memory_space<vmem>>, vector<32x256xf32>
      tpu.vector_store %arg6[%c0_14, %c0_15], %16 {strides = array<i32>} : memref<32x256xf32, #tpu.memory_space<vmem>>, vector<32x256xf32>,
    } else {
    }
    return
  }
  func.func @transform_0(%arg0: i32, %arg1: i32, %arg2: i32) -> (i32, i32) {
    %c0_i32 = arith.constant 0 : i32
    return %arg1, %arg2 : i32, i32
  }
  func.func @transform_1(%arg0: i32, %arg1: i32, %arg2: i32) -> (i32, i32) {
    %c0_i32 = arith.constant 0 : i32
    return %arg2, %arg0 : i32, i32
  }
  func.func @transform_2(%arg0: i32, %arg1: i32, %arg2: i32) -> (i32, i32) {
    %c0_i32 = arith.constant 0 : i32
    %c0_i32_0 = arith.constant 0 : i32
    return %c0_i32, %arg0 : i32, i32
  }
  func.func @transform_3(%arg0: i32, %arg1: i32, %arg2: i32) -> (i32, i32) {
    %c0_i32 = arith.constant 0 : i32
    return %arg1, %arg0 : i32, i32
  }
}

</mosaic_0001>

<bundles_post_ra>
// kernel: _forward_impl.1
= control target key start
LH: loop header
LB: loop body
LE: loop exit
PB: predicated region body
PF: predicated region fallthrough
CT: control target
= control target key end

     0   :  { %8 = vsyncpa [#allocation4], 0  ;;  %s878_s0 = inlined_call_operand.vmem [shape: f32[32,4], index: 0, kind: input, shape index: {}]   ;;  %s879_s1 = inlined_call_operand.vmem [shape: f32[4,512], index: 1, kind: input, shape index: {}]   ;;  %s880_s2 = inlined_call_operand.vmem [shape: f32[1,512], index: 2, kind: input, shape index: {}]   ;;  %s881_s3 = inlined_call_operand.hbm [shape: f32[32,512], index: 3, kind: output, shape index: {}]  }
   0x1   :  { %10 = vsyncpa [#allocation4 + $0x1], 0  ;;  %s755_s12 = smov 0   ;;  %s757_s13 = smov 0  }
   0x2   :  { %s759_s14 = smov 0   ;;  %s761_s15 = smov 0  }
   0x3   :  { %s763_s16 = smov 0   ;;  %s765_s17 = smov 0  }
   0x4 LB: > { %s550_s18 = sadd.s32 4294967295, %s730_s17   ;;  %s551_s19 = sadd.s32 4294967294, %s730_s17   ;;  %s730_s17 = sphi %s765_s17, %s16_s17   ;;  %s726_s16 = sphi %s763_s16, %s888_s16   ;;  %s722_s15 = sphi %s761_s15, %s887_s15   ;;  %s718_s14 = sphi %s759_s14, %s886_s14   ;;  %s714_s13 = sphi %s757_s13, %s885_s13   ;;  %s710_s12 = sphi %s755_s12, %s884_s12  }
   0x5   : > { %s35_s20 = sadd.s32 1, %s726_s16  ;;  %s126_s21 = sadd.s32 1, %s718_s14 }
   0x6   : > { %p37_p0 = scmp.ge.s32.totalorder %s35_s20, 2  ;;  %p136_p1 = scmp.ne.s32.totalorder %s718_s14, %s714_s13 }
   0x7   : > { %p137_p2 = scmp.eq.s32.totalorder %s550_s18, 1  ;;  %p142_p3 = scmp.ne.s32.totalorder %s714_s13, %s710_s12 }
   0x8   : > { %s890_s20 = smov (%p37_p0, %s35_s20), 0  ;;  %p143_p5 = scmp.eq.s32.totalorder %s551_s19, 1 }
   0x9   : > { %p795_p4 = por %p137_p2, %p136_p1  ;;  %s122_s23 = ssub.s32 %s726_s16, %s890_s20 }
   0xa   : > { %p555_p6 = scmp.ge.s32.totalorder %s730_s17, 1  ;;  %p124_p7 = scmp.eq.s32.totalorder %s122_s23, 0 }
   0xb   : > { %p802_p8 = por %p143_p5, %p142_p3  ;;  %p194_p9 = scmp.lt.s32.totalorder %s730_s17, 3 }
   0xc   : > { %s808_s25 = scalar_select %p124_p7, %s718_s14, %s126_s21  }
   0xd   : > { %p195_p10 = pnand %p555_p6, %p194_p9 }
   0xe   : > { %s557_s26 = sshll.u32 (!%p195_p10), %s722_s15, 1  ;;  %s231_s23 = sand.u32 (!%p195_p10), 1, %s714_s13  }
   0xf   : > { %198 = sbr.rel (%p195_p10) target bundleno = 188 (0xbc), region = 32  ;;  %p246_p11 = scmp.lt.s32.totalorder (!%p195_p10), %s557_s26, 3 }
  0x10   : > { %s575_s28 = sshll.u32 (!%p195_p10), %s722_s15, 4  ;;  %s423_s6 = scalar_lea.sflag (!%p195_p10), [#allocation4], %s231_s23 }
  0x11   : > { %s437_s4 = scalar_lea.hbm (!%p195_p10), %s881_s3, %s575_s28  ;;  %s672_s11 = scalar_lea.hbm (!%p195_p10), %s881_s3, 128 }
  0x12   : > { %s440_s15 = sshll.u32 (!%p195_p10), %s437_s4, 4  ;;  %s441_s15 = int_to_ptr.hbm [resolvable:$true] %s440_s15 }
  0x13   : > { %s666_s7 = sshra.s32 (!%p195_p10), %s441_s15, 4  ;;  %s667_s7 = int_to_ptr.hbm [resolvable:$true] %s666_s7 }
  0x14   : > { %s892_s26 = smov (!%p246_p11, %s557_s26), 3  ;;  %vm302_vm0 = vcmask 1043456   ;;  %v282_v1 = vld [vmem:[%s878_s0 + $0x10] sm:$0xff]  ;;  %vm289_vm1 = vcmask 31744   ;;  %v280_v4 = vld [vmem:[%s878_s0] sm:$0xff]  ;;  %v283_v5 = vld [vmem:[%s878_s0 + $0x18] sm:$0xff]  ;;  %p673_p1 = scmp.lt.s32.totalorder %s667_s7, %s881_s3 }
  0x15   : > { %s558_s27 = sshll.u32 %s892_s26, 2  ;;  %v281_v6 = vld [vmem:[%s878_s0 + $0x8] sm:$0xff]  ;;  %s256_s21 = scalar_lea.vmem %s880_s2, %s892_s26 }
  0x16   : > { %s251_s30 = scalar_lea.vmem %s879_s1, %s558_s27  ;;  %v392_v7 = vld [vmem:[%s256_s21] sm:$0x3]  ;;  %s556_s27 = sshll.u32 %s231_s23, 6 }
  0x17   : > { %v284_v0 = vld [vmem:[%s251_s30] sm:$0xff]  ;;  %v394_v8 = vperm.slane %v392_v7, 0  ;;  %v395_v9 = vperm.slane %v392_v7, 1  ;;  %s233_s26 = scalar_lea.vmem [#allocation3], %s556_s27  ;;  %s668_s8 = scalar_lea.hbm %s667_s7, 64 }
  0x18   : > { %286 = vst [vmem:[#allocation1] ss:$2 sm:$0xff] %v284_v0  ;;  %s438_s5 = sshll.u32 %s233_s26, 4  ;;  %p669_p12 = scmp.ne.s32.totalorder %s667_s7, %s668_s8  ;;  %s439_s5 = int_to_ptr.vmem [resolvable:$true] %s438_s5 }
  0x19   : > { %p674_p2 = scmp.lt.s32.totalorder %s672_s11, %s668_s8 }
  0x1a   : > { %p670_p13 = pnand %p669_p12, %p795_p4 }
  0x1b   : > { %p675_p3 = por %p674_p2, %p673_p1 }
  0x1c   : > { %p671_p0 = pneg %p670_p13 }
  0x1e   : > { %p676_p5 = pnand %p675_p3, %p671_p0 }
  0x1f   : > { %v287_v2 = vld.sshfl [vmem:[#allocation1] sm:$0xff pattern:$0x75316420]  ;;  %v288_v3 = vld.sshfl [vmem:[#allocation1 + $0x8] sm:$0xff pattern:$0x75316420] }
  0x20   : > { %576 = vmatpush.msk.msra.mxu2 %vm302_vm0, %v287_v2  ;;  %577 = vmatpush.msk.msra.mxu3 %vm302_vm0, %v288_v3 }
  0x21   : > { %563 = vmatmul.msk.f32.vlgmr.msra.gmra.mxu2 %vm289_vm1, %v282_v1  ;;  %568 = vmatmul.msk.f32.vlgmr.msra.gmra.mxu3 %vm289_vm1, %v282_v1 }
  0x22   : > { %560 = vmatpush.msk.msra.mxu0 %vm302_vm0, %v287_v2  ;;  %565 = vmatpush.msk.msra.mxu1 %vm302_vm0, %v288_v3 }
  0x23   : > { %561 = vmatmul.msk.f32.vlgmr.msra.gmra.mxu0 %vm289_vm1, %v280_v4  ;;  %566 = vmatmul.msk.f32.vlgmr.msra.gmra.mxu1 %vm289_vm1, %v280_v4 }
  0x29   : > { %564 = vmatmul.msk.f32.gmra.mxu2 %vm289_vm1, %v283_v5  ;;  %569 = vmatmul.msk.f32.gmra.mxu3 %vm289_vm1, %v283_v5 }
  0x2b   : > { %562 = vmatmul.msk.f32.gmra.mxu0 %vm289_vm1, %v281_v6  ;;  %567 = vmatmul.msk.f32.gmra.mxu1 %vm289_vm1, %v281_v6 }
  0xa0   : > { %v324_v10 = vpop.f32.mrf.mxu0  ;;  %v353_v11 = vpop.f32.mrf.mxu1 }
  0xa1   : > { %v398_v12 = vadd.f32 %v394_v8, %v324_v10  ;;  %v399_v13 = vadd.f32 %v395_v9, %v353_v11 }
  0xa3   : > { %636 = vtanh.f32 %v398_v12 }
  0xa4   : > { %v330_v14 = vpop.f32.mrf.mxu2  ;;  %638 = vtanh.f32 %v399_v13  ;;  %v359_v15 = vpop.f32.mrf.mxu3 }
  0xa5   : > { %v402_v16 = vadd.f32 %v394_v8, %v330_v14  ;;  %v403_v17 = vadd.f32 %v395_v9, %v359_v15 }
  0xa7   : > { %640 = vtanh.f32 %v402_v16 }
  0xa8   : > { %642 = vtanh.f32 %v403_v17  ;;  %v327_v18 = vpop.f32.mrf.mxu0  ;;  %v356_v19 = vpop.f32.mrf.mxu1 }
  0xa9   : > { %v637_v20 = vpop.eup %636  ;;  %v400_v21 = vadd.f32 %v394_v8, %v327_v18  ;;  %v401_v22 = vadd.f32 %v395_v9, %v356_v19 }
  0xaa   : > { %v639_v23 = vpop.eup %638  ;;  %414 = vst [vmem:[%s233_s26] sm:$0xff] %v637_v20 }
  0xab   : > { %415 = vst [vmem:[%s233_s26 + $0x8] sm:$0xff] %v639_v23  ;;  %644 = vtanh.f32 %v400_v21 }
  0xac   : > { %v333_v24 = vpop.f32.mrf.mxu2  ;;  %646 = vtanh.f32 %v401_v22  ;;  %v362_v25 = vpop.f32.mrf.mxu3 }
  0xad   : > { %v641_v26 = vpop.eup %640  ;;  %v404_v27 = vadd.f32 %v394_v8, %v333_v24  ;;  %v405_v28 = vadd.f32 %v395_v9, %v362_v25 }
  0xae   : > { %v643_v29 = vpop.eup %642  ;;  %418 = vst [vmem:[%s233_s26 + $0x20] sm:$0xff] %v641_v26 }
  0xaf   : > { %419 = vst [vmem:[%s233_s26 + $0x28] sm:$0xff] %v643_v29  ;;  %648 = vtanh.f32 %v404_v27 }
  0xb0   : > { %650 = vtanh.f32 %v405_v28 }
  0xb1   : > { %v645_v30 = vpop.eup %644 }
  0xb2   : > { %v647_v31 = vpop.eup %646  ;;  %416 = vst [vmem:[%s233_s26 + $0x10] sm:$0xff] %v645_v30 }
  0xb3   : > { %417 = vst [vmem:[%s233_s26 + $0x18] sm:$0xff] %v647_v31 }
  0xb5   : > { %v649_v32 = vpop.eup %648 }
  0xb6   : > { %v651_v33 = vpop.eup %650  ;;  %420 = vst [vmem:[%s233_s26 + $0x30] sm:$0xff] %v649_v32 }
  0xb7   : > { %421 = vst [vmem:[%s233_s26 + $0x38] sm:$0xff] %v651_v33 }
  0xb8   : > { %679 = shalt.err (!%p676_p5)
}
  0xb9   : > { %s732_s21 = smov 256   ;;  %s733_s23 = smov 512  }
  0xba   : > { %s734_s27 = smov 16  }
  0xbb   : > { %578 = dma.vmem_to_hbm [thread:$0]  (%p795_p4), %s439_s5, 1024, %s441_s15, %s423_s6, %s732_s21, %s733_s23, %s734_s27  }
  0xbc PF: > { %p584_p6 = scmp.ge.s32.totalorder %s730_s17, 2  ;;  %s455_s26 = sand.u32 1, %s710_s12  }
  0xbd   : > { %s456_s28 = scalar_lea.sflag [#allocation4], %s455_s26 }
  0xbe   : > { %p581_p7 = pnand %p584_p6, %p802_p8 }
  0xc0   : > { %p582_p9 = pneg %p581_p7 }
  0xc2   : > { %705 = dma.done.wait (%p582_p9), %s456_s28, 1024  }
  0xc3   : > { %707 = vsyncadd (%p582_p9), %s456_s28, 4294966272  ;;  %s16_s17 = sadd.s32 1, %s730_s17   ;;  %s884_s12 = smov %s714_s13 }
  0xc4   : > { %p13_p10 = scmp.ge.s32.totalorder %s16_s17, 4   ;;  %s885_s13 = smov %s718_s14 }
  0xc5   : > { %s886_s14 = smov %s808_s25  ;;  %s887_s15 = smov %s726_s16 }
  0xc6   : > { %s888_s16 = smov %s890_s20  ;;  %15 = sbr.rel (!%p13_p10) target bundleno = 4 (0x4), region = 81 }
  0xcb   :  { %462 = vsyncpa [#allocation4], 1 }
  0xcc   :  { %464 = vsyncpa [#allocation4 + $0x1], 1 }

</bundles_post_ra>
